<compile_context>
chip_gen: v7x
topology: tpu7x:2x2x1
jax: 0.10.0
libtpu: 0.0.40
codegen_flags: <defaults>
</compile_context>

<pallas_src>
import functools

import jax
import jax.numpy as jnp
from jax.experimental import pallas as pl
from jax.experimental.pallas import tpu as pltpu


def _make_end_kernel(cb: int, n_ctx: int, suf_len: int, ctx_dim: int, csc: bool):
    """Kernel closure with static block/slice sizes.

    Refs per grid step:
      prefix_ref : (cb, 1, D)
      ctx_ref    : (n_ctx, D)      generic context (same block every step -> VMEM resident)
                   (cb, n_ctx, D)  class-specific context (CSC)
      suffix_ref : (cb, suf_len, D)
      out_ref    : (cb, S, D),  S = 1 + n_ctx + suf_len
    """

    def kernel(prefix_ref, ctx_ref, suffix_ref, out_ref):
        # Three direct sub-slice stores -- no concatenated block temp in VMEM.
        out_ref[:, 0:1, :] = prefix_ref[...].astype(out_ref.dtype)

        if csc:
            ctx_blk = ctx_ref[...]                                        # (cb, n_ctx, D)
        else:
            # Broadcast the resident (n_ctx, D) context over the class block.  This is
            # VPU filler that hides under the HBM-bound suffix/output traffic.
            ctx_blk = jnp.broadcast_to(ctx_ref[...][None, :, :], (cb, n_ctx, ctx_dim))
        out_ref[:, 1:1 + n_ctx, :] = ctx_blk.astype(out_ref.dtype)

        out_ref[:, 1 + n_ctx:1 + n_ctx + suf_len, :] = suffix_ref[...].astype(out_ref.dtype)

    return kernel


def _choose_class_block(n_cls: int, seq_len: int, ctx_dim: int, itemsize: int,
                        class_block, target_block_bytes: int) -> int:
    """Pick classes-per-step: ~1-2 MiB output block, >=8 grid steps when possible,
    preferring an exact divisor of n_cls so there is no ragged tail."""
    if class_block is not None:
        return int(max(1, min(int(class_block), n_cls)))

    bytes_per_class_out = seq_len * ctx_dim * itemsize
    cb = max(1, target_block_bytes // bytes_per_class_out)
    if n_cls >= 8:
        cb = min(cb, max(1, n_cls // 8))      # keep at least ~8 grid steps
    cb = int(min(cb, n_cls))

    # Prefer the largest divisor of n_cls <= cb (no ragged last block); fall back to a
    # ragged grid (Pallas masks the OOB rows) only if the best divisor is much smaller.
    best = 1
    for d in range(cb, 0, -1):
        if n_cls % d == 0:
            best = d
            break
    if best * 2 >= cb:
        cb = best
    return cb


def prompt_learner_forward(ctx, token_prefix, token_suffix,
                           temperature, spatial_T, ranking_scale,
                           *, class_block=None, target_block_bytes=2 * 1024 * 1024):
    """Equivalent of PromptLearnerSingle.forward() with class_token_position='end'.

    ctx:          (n_ctx, ctx_dim) generic context, or (n_cls, n_ctx, ctx_dim) CSC
    token_prefix: (n_cls, 1, ctx_dim)
    token_suffix: (n_cls, suf_len, ctx_dim)
    returns (prompts, temperature, spatial_T, ranking_scale)
      prompts: (n_cls, 1 + n_ctx + suf_len, ctx_dim)
    """
    csc = ctx.ndim == 3
    if csc:
        n_cls_ctx, n_ctx, ctx_dim = ctx.shape
    else:
        n_ctx, ctx_dim = ctx.shape
    n_cls, one, _ = token_prefix.shape
    assert one == 1
    if csc:
        assert n_cls_ctx == n_cls
    suf_len = token_suffix.shape[1]
    seq_len = 1 + n_ctx + suf_len

    out_dtype = jnp.result_type(ctx.dtype, token_prefix.dtype, token_suffix.dtype)
    itemsize = jnp.dtype(out_dtype).itemsize

    cb = _choose_class_block(n_cls, seq_len, ctx_dim, itemsize, class_block,
                             target_block_bytes)
    n_blocks = pl.cdiv(n_cls, cb)   # if cb does not divide n_cls, the last block is
                                    # partial: Pallas drops the out-of-bounds writes.

    kernel = _make_end_kernel(cb, n_ctx, suf_len, ctx_dim, csc)

    if csc:
        ctx_spec = pl.BlockSpec((cb, n_ctx, ctx_dim), lambda i: (i, 0, 0))
    else:
        # Same block index every step -> the generic context stays resident in VMEM.
        ctx_spec = pl.BlockSpec((n_ctx, ctx_dim), lambda i: (0, 0))

    # ---- VMEM accounting (double-buffered I/O blocks + broadcast temp + padding) ----
    prefix_blk = cb * 8 * ctx_dim * itemsize                 # (cb,1,D): 1-sublane tile pads to 8
    suffix_blk = cb * suf_len * ctx_dim * itemsize
    out_blk = cb * seq_len * ctx_dim * itemsize
    ctx_blk_b = (cb if csc else 1) * n_ctx * ctx_dim * itemsize
    bcast_tmp = 0 if csc else cb * n_ctx * ctx_dim * itemsize
    est_vmem = 2 * (prefix_blk + suffix_blk + out_blk + ctx_blk_b) + bcast_tmp

    default_scoped = 32 * 1024 * 1024
    vmem_limit = None
    if est_vmem > (default_scoped * 3) // 4:
        try:
            cap = int(getattr(pltpu.get_tpu_info(), "vmem_capacity_bytes",
                              64 * 1024 * 1024))
        except Exception:  # pragma: no cover - info query not available
            cap = 64 * 1024 * 1024
        vmem_limit = int(min(max(2 * est_vmem, default_scoped), cap - 8 * 1024 * 1024))

    # ---- advisory cost: pure data movement ----
    bytes_accessed = (n_cls * 1 * ctx_dim
                      + (n_cls if csc else 1) * n_ctx * ctx_dim
                      + n_cls * suf_len * ctx_dim
                      + n_cls * seq_len * ctx_dim) * itemsize
    cost = pl.CostEstimate(flops=0, transcendentals=0,
                           bytes_accessed=int(bytes_accessed))

    # NOTE: for narrow embeddings (ctx_dim < 128) the stores are lane-masked; real CLIP
    # widths (512 / 768) are lane-dense, so no repacking is done here.
    prompts = pl.pallas_call(
        kernel,
        out_shape=jax.ShapeDtypeStruct((n_cls, seq_len, ctx_dim), out_dtype),
        grid_spec=pltpu.PrefetchScalarGridSpec(
            num_scalar_prefetch=0,
            grid=(n_blocks,),
            in_specs=[
                pl.BlockSpec((cb, 1, ctx_dim), lambda i: (i, 0, 0)),
                ctx_spec,
                pl.BlockSpec((cb, suf_len, ctx_dim), lambda i: (i, 0, 0)),
            ],
            out_specs=pl.BlockSpec((cb, seq_len, ctx_dim), lambda i: (i, 0, 0)),
        ),
        compiler_params=pltpu.CompilerParams(
            dimension_semantics=("parallel",),
            vmem_limit_bytes=vmem_limit),
        cost_estimate=cost,
    )(token_prefix, ctx, token_suffix)

    return prompts, temperature, spatial_T, ranking_scale


if __name__ == "__main__":
    # Small, deterministic synthetic setup consistent with the module:
    #   n_cls classes, n_ctx learned context tokens, ctx_dim embedding width,
    #   CLIP-style sequence: [SOS] + ctx + (classname, EOS, pad...).
    n_cls, n_ctx, ctx_dim = 6, 4, 128     # ctx_dim multiple of 128 -> lane-dense stores
    suf_len = 11                          # seq_len = 1 + 4 + 11 = 16
    dtype = jnp.float32

    key = jax.random.PRNGKey(0)
    k_ctx, k_pre, k_suf, k_csc = jax.random.split(key, 4)

    # nn.init.normal_(ctx_vectors, std=0.02)
    ctx = (0.02 * jax.random.normal(k_ctx, (n_ctx, ctx_dim))).astype(dtype)
    # register_buffer token_prefix / token_suffix (stand-ins for CLIP token embeddings)
    token_prefix = jax.random.normal(k_pre, (n_cls, 1, ctx_dim)).astype(dtype)
    token_suffix = jax.random.normal(k_suf, (n_cls, suf_len, ctx_dim)).astype(dtype)

    temperature = jnp.asarray(3.0, dtype=dtype)
    spatial_T = jnp.asarray(3.0, dtype=dtype)
    ranking_scale = jnp.asarray(4.0, dtype=dtype)

    # Reference (pure JAX): expand ctx over classes, concat tokens.
    ctx_exp = jnp.broadcast_to(ctx[None], (n_cls, n_ctx, ctx_dim))
    prompts_ref = jnp.concatenate([token_prefix, ctx_exp, token_suffix], axis=1)

    # 1) Generic context, auto block size.
    fwd = jax.jit(prompt_learner_forward)
    prompts, temp, sp_T, rk = jax.block_until_ready(
        fwd(ctx, token_prefix, token_suffix, temperature, spatial_T, ranking_scale))
    assert prompts.shape == (n_cls, 1 + n_ctx + suf_len, ctx_dim)
    assert jnp.allclose(prompts, prompts_ref)
    assert float(temp) == 3.0 and float(sp_T) == 3.0 and float(rk) == 4.0

    # 2) Multi-block path with an exact divisor of n_cls (2 grid steps of 3 classes).
    fwd_div = jax.jit(functools.partial(prompt_learner_forward, class_block=3))
    prompts_div, *_ = jax.block_until_ready(
        fwd_div(ctx, token_prefix, token_suffix, temperature, spatial_T, ranking_scale))
    assert jnp.allclose(prompts_div, prompts_ref)

    # 3) Ragged-tail path (blocks of 4 over 6 classes; last block is partial and Pallas
    #    masks the out-of-bounds class rows).
    fwd_rag = jax.jit(functools.partial(prompt_learner_forward, class_block=4))
    prompts_rag, *_ = jax.block_until_ready(
        fwd_rag(ctx, token_prefix, token_suffix, temperature, spatial_T, ranking_scale))
    assert jnp.allclose(prompts_rag, prompts_ref)

    # 4) Class-specific context (CSC) path.
    ctx_csc = (0.02 * jax.random.normal(k_csc, (n_cls, n_ctx, ctx_dim))).astype(dtype)
    prompts_csc, *_ = jax.block_until_ready(
        fwd(ctx_csc, token_prefix, token_suffix, temperature, spatial_T, ranking_scale))
    prompts_csc_ref = jnp.concatenate([token_prefix, ctx_csc, token_suffix], axis=1)
    assert jnp.allclose(prompts_csc, prompts_csc_ref)

    print("KERNEL_OK")
</pallas_src>

<mosaic_0001>
module attributes {stable_mosaic.version = 11 : i64} {
  func.func @kernel(%arg0: i32, %arg1: memref<6x1x128xf32, #tpu.memory_space<vmem>>, %arg2: memref<4x128xf32, #tpu.memory_space<vmem>>, %arg3: memref<6x11x128xf32, #tpu.memory_space<vmem>>, %arg4: memref<6x16x128xf32, #tpu.memory_space<vmem>>) attributes {dimension_semantics = [#tpu.dimension_semantics<parallel>], iteration_bounds = array<i64: 1>, scalar_prefetch = 0 : i64, scratch_operands = 0 : i64, tpu.core_type = #tpu.core_type<tc>, window_params = [{transform_indices = @transform_0, window_bounds = array<i64: 6, 1, 128>}, {pipeline_mode = #tpu.pipeline_mode<synchronous>, transform_indices = @transform_1, window_bounds = array<i64: 4, 128>}, {transform_indices = @transform_2, window_bounds = array<i64: 6, 11, 128>}, {transform_indices = @transform_3, window_bounds = array<i64: 6, 16, 128>}]} {
    %c0 = arith.constant 0 : index
    %c0_0 = arith.constant 0 : index
    %c0_1 = arith.constant 0 : index
    %0 = vector.load %arg1[%c0, %c0_0, %c0_1] : memref<6x1x128xf32, #tpu.memory_space<vmem>>, vector<6x1x128xf32>
    %c0_2 = arith.constant 0 : index
    %c0_3 = arith.constant 0 : index
    %c0_4 = arith.constant 0 : index
    %1 = vector.load %arg4[%c0_2, %c0_3, %c0_4] : memref<6x16x128xf32, #tpu.memory_space<vmem>>, vector<6x1x128xf32>
    tpu.vector_store %arg4[%c0_2, %c0_3, %c0_4], %0 {strides = array<i32>} : memref<6x16x128xf32, #tpu.memory_space<vmem>>, vector<6x1x128xf32>,
    %c0_5 = arith.constant 0 : index
    %c0_6 = arith.constant 0 : index
    %2 = vector.load %arg2[%c0_5, %c0_6] : memref<4x128xf32, #tpu.memory_space<vmem>>, vector<4x128xf32>
    %3 = vector.shape_cast %2 : vector<4x128xf32> to vector<1x4x128xf32>
    %4 = vector.shape_cast %3 : vector<1x4x128xf32> to vector<1x4x128xf32>
    %5 = vector.broadcast %4 : vector<1x4x128xf32> to vector<6x4x128xf32>
    %c0_7 = arith.constant 0 : index
    %c1 = arith.constant 1 : index
    %c0_8 = arith.constant 0 : index
    %6 = vector.load %arg4[%c0_7, %c1, %c0_8] : memref<6x16x128xf32, #tpu.memory_space<vmem>>, vector<6x4x128xf32>
    tpu.vector_store %arg4[%c0_7, %c1, %c0_8], %5 {strides = array<i32>} : memref<6x16x128xf32, #tpu.memory_space<vmem>>, vector<6x4x128xf32>,
    %c0_9 = arith.constant 0 : index
    %c0_10 = arith.constant 0 : index
    %c0_11 = arith.constant 0 : index
    %7 = vector.load %arg3[%c0_9, %c0_10, %c0_11] : memref<6x11x128xf32, #tpu.memory_space<vmem>>, vector<6x11x128xf32>
    %c0_12 = arith.constant 0 : index
    %c5 = arith.constant 5 : index
    %c0_13 = arith.constant 0 : index
    %8 = vector.load %arg4[%c0_12, %c5, %c0_13] : memref<6x16x128xf32, #tpu.memory_space<vmem>>, vector<6x11x128xf32>
    tpu.vector_store %arg4[%c0_12, %c5, %c0_13], %7 {strides = array<i32>} : memref<6x16x128xf32, #tpu.memory_space<vmem>>, vector<6x11x128xf32>,
    return
  }
  func.func @transform_0(%arg0: i32) -> (i32, i32, i32) {
    %c0_i32 = arith.constant 0 : i32
    %c0_i32_0 = arith.constant 0 : i32
    %c0_i32_1 = arith.constant 0 : i32
    return %arg0, %c0_i32, %c0_i32_0 : i32, i32, i32
  }
  func.func @transform_1(%arg0: i32) -> (i32, i32) {
    %c0_i32 = arith.constant 0 : i32
    %c0_i32_0 = arith.constant 0 : i32
    %c0_i32_1 = arith.constant 0 : i32
    return %c0_i32, %c0_i32_0 : i32, i32
  }
  func.func @transform_2(%arg0: i32) -> (i32, i32, i32) {
    %c0_i32 = arith.constant 0 : i32
    %c0_i32_0 = arith.constant 0 : i32
    %c0_i32_1 = arith.constant 0 : i32
    return %arg0, %c0_i32, %c0_i32_0 : i32, i32, i32
  }
  func.func @transform_3(%arg0: i32) -> (i32, i32, i32) {
    %c0_i32 = arith.constant 0 : i32
    %c0_i32_0 = arith.constant 0 : i32
    %c0_i32_1 = arith.constant 0 : i32
    return %arg0, %c0_i32, %c0_i32_0 : i32, i32, i32
  }
}

</mosaic_0001>

<bundles_post_ra>
// kernel: prompt_learner_forward.1
= control target key start
LH: loop header
LB: loop body
LE: loop exit
PB: predicated region body
PF: predicated region fallthrough
CT: control target
= control target key end

     0   :  { %s101_s7 = smov [#allocation2]   ;;  %s193_s0 = inlined_call_operand.vmem [shape: f32[6,1,128], index: 0, kind: input, shape index: {}]   ;;  %s194_s1 = inlined_call_operand.vmem [shape: f32[4,128], index: 1, kind: input, shape index: {}]   ;;  %s195_s2 = inlined_call_operand.vmem [shape: f32[6,11,128], index: 2, kind: input, shape index: {}]   ;;  %s196_s3 = inlined_call_operand.hbm [shape: f32[6,16,128], index: 3, kind: output, shape index: {}]  }
   0x1   :  { %v15_v0 = vld [vmem:[%s193_s0] sm:$0x1]  ;;  %v16_v1 = vld [vmem:[%s193_s0 + $0x1] sm:$0x1]  ;;  %v17_v2 = vld [vmem:[%s193_s0 + $0x2] sm:$0x1] }
   0x2   :  { %21 = vst [vmem:[#allocation2] sm:$0x1] %v15_v0  ;;  %22 = vst [vmem:[#allocation2 + $0x10] sm:$0x1] %v16_v1  ;;  %v18_v3 = vld [vmem:[%s193_s0 + $0x3] sm:$0x1] }
   0x3   :  { %23 = vst [vmem:[#allocation2 + $0x20] sm:$0x1] %v17_v2  ;;  %v19_v4 = vld [vmem:[%s193_s0 + $0x4] sm:$0x1]  ;;  %v20_v5 = vld [vmem:[%s193_s0 + $0x5] sm:$0x1] }
   0x4   :  { %24 = vst [vmem:[#allocation2 + $0x30] sm:$0x1] %v18_v3  ;;  %25 = vst [vmem:[#allocation2 + $0x40] sm:$0x1] %v19_v4  ;;  %v27_v6 = vld [vmem:[%s194_s1] sm:$0xf] }
   0x5   :  { %26 = vst [vmem:[#allocation2 + $0x50] sm:$0x1] %v20_v5  ;;  %v34_v7 = vld [vmem:[%s195_s2] sm:$0xff]  ;;  %v35_v8 = vld [vmem:[%s195_s2 + $0x8] sm:$0x7]  ;;  %v36_v9 = vld [vmem:[%s195_s2 + $0x10] sm:$0xff] }
   0x6   :  { %28 = vst [vmem:[#allocation2 + $0x1] sm:$0xf] %v27_v6  ;;  %29 = vst [vmem:[#allocation2 + $0x11] sm:$0xf] %v27_v6  ;;  %v37_v10 = vld [vmem:[%s195_s2 + $0x18] sm:$0x7] }
   0x7   :  { %30 = vst [vmem:[#allocation2 + $0x21] sm:$0xf] %v27_v6  ;;  %31 = vst [vmem:[#allocation2 + $0x31] sm:$0xf] %v27_v6  ;;  %v38_v11 = vld [vmem:[%s195_s2 + $0x20] sm:$0xff]  ;;  %s63_s8 = sshll.u32 %s101_s7, 4  ;;  %s64_s8 = int_to_ptr.vmem [resolvable:$true] %s63_s8 }
   0x8   :  { %32 = vst [vmem:[#allocation2 + $0x41] sm:$0xf] %v27_v6  ;;  %33 = vst [vmem:[#allocation2 + $0x51] sm:$0xf] %v27_v6  ;;  %v39_v12 = vld [vmem:[%s195_s2 + $0x28] sm:$0x7] }
   0x9   :  { %46 = vst [vmem:[#allocation2 + $0x5] sm:$0xff] %v34_v7  ;;  %47 = vst [vmem:[#allocation2 + $0xd] sm:$0x7] %v35_v8  ;;  %v40_v13 = vld [vmem:[%s195_s2 + $0x30] sm:$0xff]  ;;  %v41_v14 = vld [vmem:[%s195_s2 + $0x38] sm:$0x7] }
   0xa   :  { %48 = vst [vmem:[#allocation2 + $0x15] sm:$0xff] %v36_v9  ;;  %49 = vst [vmem:[#allocation2 + $0x1d] sm:$0x7] %v37_v10  ;;  %v42_v15 = vld [vmem:[%s195_s2 + $0x40] sm:$0xff]  ;;  %v43_v16 = vld [vmem:[%s195_s2 + $0x48] sm:$0x7] }
   0xb   :  { %50 = vst [vmem:[#allocation2 + $0x25] sm:$0xff] %v38_v11  ;;  %51 = vst [vmem:[#allocation2 + $0x2d] sm:$0x7] %v39_v12  ;;  %v44_v17 = vld [vmem:[%s195_s2 + $0x50] sm:$0xff]  ;;  %v45_v18 = vld [vmem:[%s195_s2 + $0x58] sm:$0x7] }
   0xc   :  { %52 = vst [vmem:[#allocation2 + $0x35] sm:$0xff] %v40_v13  ;;  %53 = vst [vmem:[#allocation2 + $0x3d] sm:$0x7] %v41_v14 }
   0xd   :  { %54 = vst [vmem:[#allocation2 + $0x45] sm:$0xff] %v42_v15  ;;  %55 = vst [vmem:[#allocation2 + $0x4d] sm:$0x7] %v43_v16 }
   0xe   :  { %56 = vst [vmem:[#allocation2 + $0x55] sm:$0xff] %v44_v17 }
   0xf   :  { %8 = vsyncpa [#allocation3], 0  ;;  %57 = vst [vmem:[#allocation2 + $0x5d] sm:$0x7] %v45_v18  ;;  %s77_s23 = scalar_lea.vmem %s64_s8, 1536  ;;  %p82_p1 = scmp.lt.s32.totalorder %s64_s8, %s64_s8 }
  0x10   :  { %p78_p0 = scmp.ne.s32.totalorder %s64_s8, %s77_s23  ;;  %p83_p2 = scmp.lt.s32.totalorder %s77_s23, %s77_s23 }
  0x12   :  { %p84_p3 = por %p83_p2, %p82_p1 }
  0x14   :  { %p85_p4 = pnand %p84_p3, %p78_p0 }
  0x16   :  { %88 = shalt.err (!%p85_p4)
}
  0x17   :  { %s89_s26 = scalar_lea.hbm %s196_s3, 1536 }
  0x18   :  { %p90_p5 = scmp.ne.s32.totalorder %s196_s3, %s89_s26  ;;  %p93_p6 = scmp.lt.u32.totalorder %s89_s26, %s196_s3 }
  0x1a   :  { %p95_p7 = pnand %p93_p6, %p90_p5 }
  0x1c   :  { %98 = shalt.err (!%p95_p7)
}
  0x1d   :  { %s102_s2 = smov 128   ;;  %s103_s30 = smov 8  }
  0x1e   :  { %69 = dma.vmem_to_hbm [thread:$0]  %s64_s8, 1536, %s196_s3, [#allocation3], %s102_s2, %s102_s2, %s103_s30  }
  0x1f   :  { %99 = dma.done.wait [#allocation3], 1536  }
  0x20   :  { %100 = vsyncadd [#allocation3], 4294965760 }
  0x21   :  { %73 = vsyncpa [#allocation3], 1 }

</bundles_post_ra>
